<compile_context>
chip_gen: v7x
topology: tpu7x:2x2x1
jax: 0.10.0
libtpu: 0.0.40
codegen_flags: <defaults>
</compile_context>

<pallas_src>
import math
import jax
import jax.numpy as jnp
from jax.experimental import pallas as pl
from jax.experimental.pallas import tpu as pltpu


# Conservative buffer budget: fits v7x's 64 MiB physical VMEM per TensorCore
# with ~50% headroom; v5e/v6e (128 MiB) trivially fit.
_VMEM_BUFFER_BUDGET = 32 * 1024 * 1024
_VMEM_LIMIT_BYTES = 48 * 1024 * 1024
# Weights larger than this get a single (non-double-buffered) VMEM buffer.
_WEIGHT_SINGLE_BUFFER_BYTES = 4 * 1024 * 1024


def per_patch_mlp_kernel(x_ref, w_ref, b_ref, o_ref):
    # x_ref: (tm, P)   w_ref: (P, C)   b_ref: (1, C)   o_ref: (tm, C)
    acc = jnp.dot(x_ref[...], w_ref[...], preferred_element_type=jnp.float32)
    acc = acc + b_ref[...].astype(jnp.float32)          # broadcast (1, C) -> (tm, C)
    o_ref[...] = acc.astype(o_ref.dtype)


def _sublane_multiple(dtype):
    """Sublane packing multiple for a dtype: 8 (4B), 16 (2B), 32 (1B)."""
    return {4: 8, 2: 16, 1: 32}.get(jnp.dtype(dtype).itemsize, 8)


def _pick_row_tile(M, P, C, x_itemsize, o_itemsize, resident_bytes, block_m, sub):
    """Largest row tile <= block_m that fits the VMEM buffer budget."""
    per_row = 2 * (P * x_itemsize + C * o_itemsize)   # x + out, double-buffered
    tm_vmem = max(sub, (_VMEM_BUFFER_BUDGET - resident_bytes) // per_row)
    tm = min(block_m, tm_vmem, M)
    if tm >= M:
        return M                                       # full extent: always legal
    align = 128 if tm >= 128 else sub                  # keep MXU M dimension full
    return max(sub, (tm // align) * align)


def per_patch_mlp(x, w, b, *, block_m=1024):
    """x: [B, T, P]; w: [P, C] (pre-transposed PyTorch weight); b: [1, C]."""
    B, T, P = x.shape
    C = w.shape[1]
    M = B * T

    # Flatten batch*tokens into one large row dimension for the MXU.
    x2 = x.reshape(M, P)

    dx = jnp.dtype(x.dtype).itemsize
    dw = jnp.dtype(w.dtype).itemsize
    db = jnp.dtype(b.dtype).itemsize
    do = dx                                            # output dtype == input dtype

    weight_buf_bytes = P * C * dw
    weight_single_buffer = weight_buf_bytes > _WEIGHT_SINGLE_BUFFER_BYTES
    n_w_bufs = 1 if weight_single_buffer else 2
    resident_bytes = n_w_bufs * weight_buf_bytes + 2 * C * db

    sub = _sublane_multiple(x.dtype)
    tm = _pick_row_tile(M, P, C, dx, do, resident_bytes, block_m, sub)

    grid_steps = pl.cdiv(M, tm)
    if grid_steps == 1 and M >= 256:
        # Give v7x's second TensorCore a tile instead of a 1-step grid.
        half = -(-M // 2)
        tm = max(128, ((half + sub - 1) // sub) * sub)
        grid_steps = pl.cdiv(M, tm)
    grid = (grid_steps,)

    if weight_single_buffer:
        w_spec = pl.BlockSpec((P, C), lambda i: (0, 0), pipeline_mode=pl.Buffered(1))
    else:
        w_spec = pl.BlockSpec((P, C), lambda i: (0, 0))

    grid_spec = pltpu.PrefetchScalarGridSpec(
        num_scalar_prefetch=0,
        grid=grid,
        in_specs=[
            pl.BlockSpec((tm, P), lambda i: (i, 0)),    # x rows: tiled over grid
            w_spec,                                     # weight: resident
            pl.BlockSpec((1, C), lambda i: (0, 0)),     # bias:   resident
        ],
        out_specs=pl.BlockSpec((tm, C), lambda i: (i, 0)),
    )

    cost = pl.CostEstimate(
        flops=2 * M * P * C,
        transcendentals=0,
        bytes_accessed=M * P * dx + P * C * dw + C * db + M * C * do,
    )

    out = pl.pallas_call(
        per_patch_mlp_kernel,
        out_shape=jax.ShapeDtypeStruct((M, C), x.dtype),
        grid_spec=grid_spec,
        compiler_params=pltpu.CompilerParams(
            dimension_semantics=(("parallel",) if grid_steps > 1 else ("arbitrary",)),
            vmem_limit_bytes=_VMEM_LIMIT_BYTES,
        ),
        cost_estimate=cost,
    )(x2, w, b)

    return out.reshape(B, T, C)


def reference(x, w, b):
    return (jnp.einsum("btp,pc->btc", x.astype(jnp.float32), w.astype(jnp.float32))
            + b.reshape(1, 1, -1).astype(jnp.float32)).astype(x.dtype)


if __name__ == "__main__":
    # Small shapes consistent with the module: batch=2, n_tokens=16,
    # n_pixels=48 (e.g. 4x4 patch x 3 channels), n_channel=32.
    B, T, P, C = 2, 16, 48, 32
    key = jax.random.PRNGKey(0)
    k_x, k_w, k_b = jax.random.split(key, 3)

    x = jax.random.normal(k_x, (B, T, P), dtype=jnp.float32)

    # PyTorch-style Linear init (uniform in +-1/sqrt(in_features)),
    # stored as [in_features, out_features] = W.T for the kernel.
    bound = 1.0 / math.sqrt(P)
    w = jax.random.uniform(k_w, (P, C), minval=-bound, maxval=bound, dtype=jnp.float32)
    b = jax.random.uniform(k_b, (1, C), minval=-bound, maxval=bound, dtype=jnp.float32)

    ref = reference(x, w, b)

    # Default (large-tile) path: single full-extent tile at these small shapes.
    out = jax.block_until_ready(per_patch_mlp(x, w, b))
    assert out.shape == (B, T, C)
    assert jnp.allclose(out, ref, atol=1e-5, rtol=1e-5), float(jnp.max(jnp.abs(out - ref)))

    # Small-tile path: exercises the multi-step pipelined / "parallel" grid.
    out2 = jax.block_until_ready(per_patch_mlp(x, w, b, block_m=8))
    assert jnp.allclose(out2, ref, atol=1e-5, rtol=1e-5), float(jnp.max(jnp.abs(out2 - ref)))

    print("KERNEL_OK")
</pallas_src>

<mosaic_0001>
module attributes {stable_mosaic.version = 11 : i64} {
  func.func @per_patch_mlp_kernel(%arg0: i32, %arg1: memref<32x48xf32, #tpu.memory_space<vmem>>, %arg2: memref<48x32xf32, #tpu.memory_space<vmem>>, %arg3: memref<1x32xf32, #tpu.memory_space<vmem>>, %arg4: memref<32x32xf32, #tpu.memory_space<vmem>>) attributes {dimension_semantics = [#tpu.dimension_semantics<arbitrary>], iteration_bounds = array<i64: 1>, scalar_prefetch = 0 : i64, scratch_operands = 0 : i64, tpu.core_type = #tpu.core_type<tc>, window_params = [{transform_indices = @transform_0, window_bounds = array<i64: 32, 48>}, {pipeline_mode = #tpu.pipeline_mode<synchronous>, transform_indices = @transform_1, window_bounds = array<i64: 48, 32>}, {pipeline_mode = #tpu.pipeline_mode<synchronous>, transform_indices = @transform_2, window_bounds = array<i64: 1, 32>}, {transform_indices = @transform_3, window_bounds = array<i64: 32, 32>}]} {
    %c0 = arith.constant 0 : index
    %c0_0 = arith.constant 0 : index
    %0 = vector.load %arg1[%c0, %c0_0] : memref<32x48xf32, #tpu.memory_space<vmem>>, vector<32x48xf32>
    %c0_1 = arith.constant 0 : index
    %c0_2 = arith.constant 0 : index
    %1 = vector.load %arg2[%c0_1, %c0_2] : memref<48x32xf32, #tpu.memory_space<vmem>>, vector<48x32xf32>
    %cst = arith.constant dense<0.000000e+00> : vector<32x32xf32>
    %2 = tpu.matmul %0, %1, %cst {dimension_numbers = #tpu.dot_dimension_numbers<[1], [0], [0], [1], [0, 0, 1, 1], [], []>} : vector<32x48xf32>, vector<48x32xf32>, vector<32x32xf32> -> vector<32x32xf32>
    %c0_3 = arith.constant 0 : index
    %c0_4 = arith.constant 0 : index
    %3 = vector.load %arg3[%c0_3, %c0_4] : memref<1x32xf32, #tpu.memory_space<vmem>>, vector<1x32xf32>
    %4 = vector.broadcast %3 : vector<1x32xf32> to vector<32x32xf32>
    %5 = arith.addf %2, %4 : vector<32x32xf32>
    %c0_5 = arith.constant 0 : index
    %c0_6 = arith.constant 0 : index
    %6 = vector.load %arg4[%c0_5, %c0_6] : memref<32x32xf32, #tpu.memory_space<vmem>>, vector<32x32xf32>
    tpu.vector_store %arg4[%c0_5, %c0_6], %5 {strides = array<i32>} : memref<32x32xf32, #tpu.memory_space<vmem>>, vector<32x32xf32>,
    return
  }
  func.func @transform_0(%arg0: i32) -> (i32, i32) {
    %c0_i32 = arith.constant 0 : i32
    %c0_i32_0 = arith.constant 0 : i32
    return %arg0, %c0_i32 : i32, i32
  }
  func.func @transform_1(%arg0: i32) -> (i32, i32) {
    %c0_i32 = arith.constant 0 : i32
    %c0_i32_0 = arith.constant 0 : i32
    %c0_i32_1 = arith.constant 0 : i32
    return %c0_i32, %c0_i32_0 : i32, i32
  }
  func.func @transform_2(%arg0: i32) -> (i32, i32) {
    %c0_i32 = arith.constant 0 : i32
    %c0_i32_0 = arith.constant 0 : i32
    %c0_i32_1 = arith.constant 0 : i32
    return %c0_i32, %c0_i32_0 : i32, i32
  }
  func.func @transform_3(%arg0: i32) -> (i32, i32) {
    %c0_i32 = arith.constant 0 : i32
    %c0_i32_0 = arith.constant 0 : i32
    return %arg0, %c0_i32 : i32, i32
  }
}

</mosaic_0001>

<bundles_post_ra>
// kernel: tpu_custom_call.1
= control target key start
LH: loop header
LB: loop body
LE: loop exit
PB: predicated region body
PF: predicated region fallthrough
CT: control target
= control target key end

     0   :  { %vm32_vm0 = vcmask 392192   ;;  %s301_s0 = inlined_call_operand.vmem [shape: f32[32,48], index: 0, kind: input, shape index: {}]   ;;  %s302_s1 = inlined_call_operand.vmem [shape: f32[48,32], index: 1, kind: input, shape index: {}]   ;;  %s303_s2 = inlined_call_operand.vmem [shape: f32[1,32], index: 2, kind: input, shape index: {}]   ;;  %s304_s3 = inlined_call_operand.hbm [shape: f32[32,32], index: 3, kind: output, shape index: {}]  }
   0x1   :  { %v19_v0 = vld [vmem:[%s302_s1] sm:$0xff]  ;;  %v20_v1 = vld [vmem:[%s302_s1 + $0x8] sm:$0xff]  ;;  %v21_v2 = vld [vmem:[%s302_s1 + $0x10] sm:$0xff] }
   0x2   :  { %v184_v3 = vpack.c.bf16 %v20_v1, %v19_v0  ;;  %v22_v4 = vld [vmem:[%s302_s1 + $0x18] sm:$0xff]  ;;  %v23_v6 = vld [vmem:[%s302_s1 + $0x20] sm:$0xff]  ;;  %v24_v7 = vld [vmem:[%s302_s1 + $0x28] sm:$0xff] }
   0x3   :  { %v188_v5 = vpack.c.bf16 %v22_v4, %v21_v2  ;;  %v15_v8 = vld [vmem:[%s301_s0] sm:$0xff]  ;;  %v17_v9 = vld [vmem:[%s301_s0 + $0x10] sm:$0xff] }
   0x4   :  { %185 = vmatprep.subr.bf16.mxu0 %v184_v3  ;;  %196 = vmatprep.subr.bf16.mxu1 %v184_v3 }
   0x5   :  { %8 = vsyncpa [#allocation3], 0  ;;  %187 = vmatpush3.bf16.msra.mxu0 %v184_v3  ;;  %199 = vmatpush3.bf16.msra.mxu1 %v184_v3  ;;  %v192_v10 = vpack.c.bf16 %v24_v7, %v23_v6  ;;  %v16_v11 = vld [vmem:[%s301_s0 + $0x8] sm:$0xff]  ;;  %v18_v12 = vld [vmem:[%s301_s0 + $0x18] sm:$0xff]  ;;  %s229_s6 = smov [#allocation2]   ;;  %vm130_vm1 = vcmask 261120  }
   0x6   :  { %189 = vmatprep.subr.bf16.mxu0 %v188_v5  ;;  %197 = vmatprep.subr.bf16.mxu1 %v188_v5  ;;  %v151_v13 = vld [vmem:[%s303_s2] ss:$0 sm:$0xff]  ;;  %s140_s7 = sshll.u32 %s229_s6, 4  ;;  %s141_s7 = int_to_ptr.vmem [resolvable:$true] %s140_s7 }
   0x7   :  { %178 = vmatprep.mubr.msk.f32.mxu0 %vm32_vm0, %v15_v8  ;;  %181 = vmatprep.mubr.msk.f32.mxu1 %vm32_vm0, %v17_v9  ;;  %s205_s0 = scalar_lea.vmem %s141_s7, 512  ;;  %p210_p1 = scmp.lt.s32.totalorder %s141_s7, %s141_s7 }
   0x8   :  { %p206_p0 = scmp.ne.s32.totalorder %s141_s7, %s205_s0  ;;  %p211_p2 = scmp.lt.s32.totalorder %s205_s0, %s205_s0 }
   0x9   :  { %191 = vmatpush3.bf16.msra.mxu0 %v188_v5  ;;  %200 = vmatpush3.bf16.msra.mxu1 %v188_v5 }
   0xa   :  { %193 = vmatprep.subr.bf16.mxu0 %v192_v10  ;;  %198 = vmatprep.subr.bf16.mxu1 %v192_v10  ;;  %p212_p3 = por %p211_p2, %p210_p1 }
   0xc   :  { %p213_p4 = pnand %p212_p3, %p206_p0 }
   0xd   :  { %195 = vmatpush3.bf16.msra.mxu0 %v192_v10  ;;  %201 = vmatpush3.bf16.msra.mxu1 %v192_v10 }
  0x10   :  { %179 = vmatmul.mubr.msk.f32.vlgmr.msra.gmra.mrb[0].mxu0 %vm32_vm0, %v16_v11  ;;  %182 = vmatmul.mubr.msk.f32.vlgmr.msra.gmra.mrb[0].mxu1 %vm32_vm0, %v18_v12 }
  0xe3   :  { %v180_v14 = vpop.f32.mrb[0].mxu0  ;;  %v183_v15 = vpop.f32.mrb[0].mxu1 }
  0xe4   :  { %v117_v16 = vadd.f32 %v180_v14, %v151_v13  ;;  %v127_v17 = vadd.f32 %v183_v15, %v151_v13  ;;  %v111_v18 = vpop.f32.mrb[1].mxu0  ;;  %v121_v19 = vpop.f32.mrb[1].mxu1 }
  0xe5   :  { %v112_v20 = vadd.f32 %v151_v13, %v111_v18  ;;  %v122_v21 = vadd.f32 %v151_v13, %v121_v19 }
  0xe6   :  { %132 = vst.msk [vmem:[#allocation2 + $0x8] sm:$0xff] %vm130_vm1, %v117_v16  ;;  %134 = vst.msk [vmem:[#allocation2 + $0x18] sm:$0xff] %vm130_vm1, %v127_v17 }
  0xe7   :  { %131 = vst.msk [vmem:[#allocation2] sm:$0xff] %vm130_vm1, %v112_v20  ;;  %133 = vst.msk [vmem:[#allocation2 + $0x10] sm:$0xff] %vm130_vm1, %v122_v21 }
  0xe8   :  { %216 = shalt.err (!%p213_p4)
}
  0xe9   :  { %s217_s9 = scalar_lea.hbm %s304_s3, 512 }
  0xea   :  { %p218_p5 = scmp.ne.s32.totalorder %s304_s3, %s217_s9  ;;  %p221_p6 = scmp.lt.u32.totalorder %s217_s9, %s304_s3 }
  0xec   :  { %p223_p7 = pnand %p221_p6, %p218_p5 }
  0xee   :  { %226 = shalt.err (!%p223_p7)
}
  0xef   :  { %s230_s14 = smov 128   ;;  %s231_s15 = smov 8  }
  0xf0   :  { %146 = dma.vmem_to_hbm [thread:$0]  %s141_s7, 512, %s304_s3, [#allocation3], %s230_s14, %s230_s14, %s231_s15  }
  0xf1   :  { %227 = dma.done.wait [#allocation3], 512  }
  0xf2   :  { %228 = vsyncadd [#allocation3], 4294966784 }
  0xf3   :  { %150 = vsyncpa [#allocation3], 1 }

</bundles_post_ra>
